<compile_context>
chip_gen: v7x
topology: tpu7x:2x2x1
jax: 0.10.0
libtpu: 0.0.40
codegen_flags: <defaults>
</compile_context>

<pallas_src>
import functools

import jax
import jax.numpy as jnp
from jax.experimental import pallas as pl
from jax.experimental.pallas import tpu as pltpu

_LANE = 128          # lane-dense output slab width
_NEG = -1e30         # bias for padded logit columns -> exp underflows to exactly 0


def _policy_kernel(x_ref, w1_ref, b1_ref, w2_ref, b2_ref, out_ref):
    # Layer 1 + ReLU; bias is a resident (1, H) row, broadcast-added on the VPU.
    h = jnp.dot(x_ref[...], w1_ref[...], preferred_element_type=jnp.float32)
    h = jnp.maximum(h + b1_ref[...], 0.0)                       # (b_tile, H)

    # Layer 2 into the 128-lane padded slab; the b2 row carries the real biases in
    # the first A columns and -1e30 in the padded columns (exactly zero softmax mass).
    logits = jnp.dot(h, w2_ref[...], preferred_element_type=jnp.float32)
    logits = logits + b2_ref[...]                               # (b_tile, 128)

    # Numerically-stable softmax over the action axis. Exact divide: the denominator
    # is only (b_tile, 1), so the approx EUP reciprocal buys nothing here.
    m = jnp.max(logits, axis=-1, keepdims=True)
    e = jnp.exp(logits - m)
    denom = jnp.sum(e, axis=-1, keepdims=True)
    out_ref[...] = (e / denom).astype(out_ref.dtype)


def prepare_params(w1, b1, w2, b2):
    """One-time weight/bias preparation -- build once and reuse (not per call).

    w1: (S, H); b1: (H,); w2: (H, A); b2: (A,)   [(in, out) = transpose of nn.Linear]
    Returns (w1_f32, b1_row, w2_pad, b2_row) for `policy_forward`.
    """
    S, H = w1.shape
    H2, A = w2.shape
    assert H2 == H and A <= _LANE
    w1_f32 = jnp.asarray(w1, jnp.float32)                                   # (S, H)
    b1_row = jnp.asarray(b1, jnp.float32).reshape(1, H)                     # (1, H)
    w2_pad = jnp.zeros((H, _LANE), jnp.float32).at[:, :A].set(
        jnp.asarray(w2, jnp.float32))                                       # (H, 128)
    b2_row = jnp.full((1, _LANE), _NEG, jnp.float32).at[0, :A].set(
        jnp.asarray(b2, jnp.float32).reshape(-1))                           # (1, 128)
    return w1_f32, b1_row, w2_pad, b2_row


def _choose_b_tile(B, max_tile):
    """Largest-reasonable batch tile: big enough to amortize the ~0.35us/step grid
    overhead, split into >= 2 tiles so v7x's two TensorCores both get work."""
    B8 = ((B + 7) // 8) * 8                      # f32 sublane multiple
    if B8 <= 8:
        return 8
    half = ((B8 // 2) + 7) // 8 * 8              # ~ceil(B/2), rounded up to mult of 8
    return max(8, min(half, max_tile))


@functools.partial(jax.jit, static_argnames=("action_dim", "max_tile", "out_dtype"))
def policy_forward(s, w1, b1_row, w2_pad, b2_row, *, action_dim, max_tile=4096,
                   out_dtype=jnp.float32):
    """s: (B, state_dim) f32; remaining args from `prepare_params`.
    Returns (B, action_dim) softmax action probabilities. The whole path
    (optional pad, pallas_call, final slice) is one jitted dispatch."""
    B, S = s.shape
    H = w1.shape[1]

    b_tile = _choose_b_tile(B, max_tile)
    grid_b = pl.cdiv(B, b_tile)
    B_pad = grid_b * b_tile
    x = s if B_pad == B else jnp.pad(s, ((0, B_pad - B), (0, 0)))  # rare fallback

    out = pl.pallas_call(
        _policy_kernel,
        out_shape=jax.ShapeDtypeStruct((B_pad, _LANE), out_dtype),
        grid_spec=pltpu.PrefetchScalarGridSpec(
            num_scalar_prefetch=0,
            grid=(grid_b,),
            in_specs=[
                pl.BlockSpec((b_tile, S), lambda i: (i, 0)),   # batch-tiled activations
                # Weights/biases: block index never changes -> fetched once and
                # resident in VMEM across all grid steps (extra default buffer is
                # ~20 KB, left at default buffering for robustness).
                pl.BlockSpec((S, H), lambda i: (0, 0)),        # layer-1 weights
                pl.BlockSpec((1, H), lambda i: (0, 0)),        # layer-1 bias row
                pl.BlockSpec((H, _LANE), lambda i: (0, 0)),    # layer-2 weights (lane-padded)
                pl.BlockSpec((1, _LANE), lambda i: (0, 0)),    # layer-2 bias + pad bias row
            ],
            out_specs=pl.BlockSpec((b_tile, _LANE), lambda i: (i, 0)),
        ),
        compiler_params=pltpu.CompilerParams(
            dimension_semantics=("parallel",),   # batch grid splits across v7x's 2 TCs
        ),
    )(x, w1, b1_row, w2_pad, b2_row)

    return out[:B, :action_dim]


def init_params(key, state_dim, action_dim, hidden_width):
    """Synthetic init; weights stored as (in, out) = transpose of PyTorch nn.Linear."""
    k1, k2, k3, k4 = jax.random.split(key, 4)
    w1 = jax.random.normal(k1, (state_dim, hidden_width), jnp.float32) * 0.1
    b1 = jax.random.normal(k2, (hidden_width,), jnp.float32) * 0.1
    w2 = jax.random.normal(k3, (hidden_width, action_dim), jnp.float32) * 0.1
    b2 = jax.random.normal(k4, (action_dim,), jnp.float32) * 0.1
    return w1, b1, w2, b2


def _reference(s, w1, b1, w2, b2):
    hp = jax.lax.Precision.HIGHEST
    h = jnp.maximum(jnp.dot(s, w1, precision=hp) + b1, 0.0)
    return jax.nn.softmax(jnp.dot(h, w2, precision=hp) + b2, axis=1)


if __name__ == "__main__":
    key = jax.random.PRNGKey(0)
    STATE_DIM, ACTION_DIM, HIDDEN = 16, 4, 32

    kx, kp, kx2 = jax.random.split(key, 3)
    w1, b1, w2, b2 = init_params(kp, STATE_DIM, ACTION_DIM, HIDDEN)

    # One-time (cached) weight prep, kept out of the per-call path.
    params = prepare_params(w1, b1, w2, b2)

    # Batched rollout states: tile selection gives b_tile=256, grid=(2,), so both
    # v7x TensorCores get work and per-step overhead is amortized.
    B = 512
    s = jax.random.normal(kx, (B, STATE_DIM), jnp.float32)
    a_prob = jax.block_until_ready(policy_forward(s, *params, action_dim=ACTION_DIM))

    ref = _reference(s, w1, b1, w2, b2)
    assert a_prob.shape == (B, ACTION_DIM)
    assert jnp.allclose(a_prob, ref, atol=1e-3, rtol=1e-3), float(jnp.max(jnp.abs(a_prob - ref)))
    # Exact (non-approx) reciprocal: rows sum to 1 to float32 rounding.
    assert jnp.allclose(jnp.sum(a_prob, axis=1), 1.0, atol=1e-5)

    # Small-batch path (single rollout step): tile clamping / single grid step.
    s_small = jax.random.normal(kx2, (8, STATE_DIM), jnp.float32)
    a_small = jax.block_until_ready(policy_forward(s_small, *params, action_dim=ACTION_DIM))
    ref_small = _reference(s_small, w1, b1, w2, b2)
    assert a_small.shape == (8, ACTION_DIM)
    assert jnp.allclose(a_small, ref_small, atol=1e-3, rtol=1e-3)
    assert jnp.allclose(jnp.sum(a_small, axis=1), 1.0, atol=1e-5)

    print("KERNEL_OK")
</pallas_src>

<mosaic_0001>
module attributes {stable_mosaic.version = 11 : i64} {
  func.func @_policy_kernel(%arg0: i32, %arg1: memref<256x16xf32, #tpu.memory_space<vmem>>, %arg2: memref<16x32xf32, #tpu.memory_space<vmem>>, %arg3: memref<1x32xf32, #tpu.memory_space<vmem>>, %arg4: memref<32x128xf32, #tpu.memory_space<vmem>>, %arg5: memref<1x128xf32, #tpu.memory_space<vmem>>, %arg6: memref<256x128xf32, #tpu.memory_space<vmem>>) attributes {dimension_semantics = [#tpu.dimension_semantics<parallel>], iteration_bounds = array<i64: 2>, scalar_prefetch = 0 : i64, scratch_operands = 0 : i64, tpu.core_type = #tpu.core_type<tc>, window_params = [{transform_indices = @transform_0, window_bounds = array<i64: 256, 16>}, {pipeline_mode = #tpu.pipeline_mode<synchronous>, transform_indices = @transform_1, window_bounds = array<i64: 16, 32>}, {pipeline_mode = #tpu.pipeline_mode<synchronous>, transform_indices = @transform_2, window_bounds = array<i64: 1, 32>}, {pipeline_mode = #tpu.pipeline_mode<synchronous>, transform_indices = @transform_3, window_bounds = array<i64: 32, 128>}, {pipeline_mode = #tpu.pipeline_mode<synchronous>, transform_indices = @transform_4, window_bounds = array<i64: 1, 128>}, {transform_indices = @transform_5, window_bounds = array<i64: 256, 128>}]} {
    %c0 = arith.constant 0 : index
    %c0_0 = arith.constant 0 : index
    %0 = vector.load %arg1[%c0, %c0_0] : memref<256x16xf32, #tpu.memory_space<vmem>>, vector<256x16xf32>
    %c0_1 = arith.constant 0 : index
    %c0_2 = arith.constant 0 : index
    %1 = vector.load %arg2[%c0_1, %c0_2] : memref<16x32xf32, #tpu.memory_space<vmem>>, vector<16x32xf32>
    %cst = arith.constant dense<0.000000e+00> : vector<256x32xf32>
    %2 = tpu.matmul %0, %1, %cst {dimension_numbers = #tpu.dot_dimension_numbers<[1], [0], [0], [1], [0, 0, 1, 1], [], []>} : vector<256x16xf32>, vector<16x32xf32>, vector<256x32xf32> -> vector<256x32xf32>
    %c0_3 = arith.constant 0 : index
    %c0_4 = arith.constant 0 : index
    %3 = vector.load %arg3[%c0_3, %c0_4] : memref<1x32xf32, #tpu.memory_space<vmem>>, vector<1x32xf32>
    %4 = vector.broadcast %3 : vector<1x32xf32> to vector<256x32xf32>
    %5 = arith.addf %2, %4 : vector<256x32xf32>
    %cst_5 = arith.constant 0.000000e+00 : f32
    %6 = vector.broadcast %cst_5 : f32 to vector<256x32xf32>
    %7 = arith.maximumf %5, %6 : vector<256x32xf32>
    %c0_6 = arith.constant 0 : index
    %c0_7 = arith.constant 0 : index
    %8 = vector.load %arg4[%c0_6, %c0_7] : memref<32x128xf32, #tpu.memory_space<vmem>>, vector<32x128xf32>
    %cst_8 = arith.constant dense<0.000000e+00> : vector<256x128xf32>
    %9 = tpu.matmul %7, %8, %cst_8 {dimension_numbers = #tpu.dot_dimension_numbers<[1], [0], [0], [1], [0, 0, 1, 1], [], []>} : vector<256x32xf32>, vector<32x128xf32>, vector<256x128xf32> -> vector<256x128xf32>
    %c0_9 = arith.constant 0 : index
    %c0_10 = arith.constant 0 : index
    %10 = vector.load %arg5[%c0_9, %c0_10] : memref<1x128xf32, #tpu.memory_space<vmem>>, vector<1x128xf32>
    %11 = vector.broadcast %10 : vector<1x128xf32> to vector<256x128xf32>
    %12 = arith.addf %9, %11 : vector<256x128xf32>
    %cst_11 = arith.constant dense<0xFF800000> : vector<256xf32>
    %13 = vector.multi_reduction <maximumf>, %12, %cst_11 [1] : vector<256x128xf32> to vector<256xf32>
    %14 = vector.shape_cast %13 : vector<256xf32> to vector<256x1xf32>
    %15 = vector.broadcast %14 : vector<256x1xf32> to vector<256x128xf32>
    %16 = arith.subf %12, %15 : vector<256x128xf32>
    %17 = math.exp %16 : vector<256x128xf32>
    %cst_12 = arith.constant dense<0.000000e+00> : vector<256xf32>
    %18 = vector.multi_reduction <add>, %17, %cst_12 [1] : vector<256x128xf32> to vector<256xf32>
    %19 = vector.shape_cast %18 : vector<256xf32> to vector<256x1xf32>
    %20 = vector.broadcast %19 : vector<256x1xf32> to vector<256x128xf32>
    %21 = arith.divf %17, %20 : vector<256x128xf32>
    %c0_13 = arith.constant 0 : index
    %c0_14 = arith.constant 0 : index
    %22 = vector.load %arg6[%c0_13, %c0_14] : memref<256x128xf32, #tpu.memory_space<vmem>>, vector<256x128xf32>
    tpu.vector_store %arg6[%c0_13, %c0_14], %21 {strides = array<i32>} : memref<256x128xf32, #tpu.memory_space<vmem>>, vector<256x128xf32>,
    return
  }
  func.func @transform_0(%arg0: i32) -> (i32, i32) {
    %c0_i32 = arith.constant 0 : i32
    %c0_i32_0 = arith.constant 0 : i32
    return %arg0, %c0_i32 : i32, i32
  }
  func.func @transform_1(%arg0: i32) -> (i32, i32) {
    %c0_i32 = arith.constant 0 : i32
    %c0_i32_0 = arith.constant 0 : i32
    %c0_i32_1 = arith.constant 0 : i32
    return %c0_i32, %c0_i32_0 : i32, i32
  }
  func.func @transform_2(%arg0: i32) -> (i32, i32) {
    %c0_i32 = arith.constant 0 : i32
    %c0_i32_0 = arith.constant 0 : i32
    %c0_i32_1 = arith.constant 0 : i32
    return %c0_i32, %c0_i32_0 : i32, i32
  }
  func.func @transform_3(%arg0: i32) -> (i32, i32) {
    %c0_i32 = arith.constant 0 : i32
    %c0_i32_0 = arith.constant 0 : i32
    %c0_i32_1 = arith.constant 0 : i32
    return %c0_i32, %c0_i32_0 : i32, i32
  }
  func.func @transform_4(%arg0: i32) -> (i32, i32) {
    %c0_i32 = arith.constant 0 : i32
    %c0_i32_0 = arith.constant 0 : i32
    %c0_i32_1 = arith.constant 0 : i32
    return %c0_i32, %c0_i32_0 : i32, i32
  }
  func.func @transform_5(%arg0: i32) -> (i32, i32) {
    %c0_i32 = arith.constant 0 : i32
    %c0_i32_0 = arith.constant 0 : i32
    return %arg0, %c0_i32 : i32, i32
  }
}

</mosaic_0001>

<bundles_post_ra>
// kernel: policy_forward.1
= control target key start
LH: loop header
LB: loop body
LE: loop exit
PB: predicated region body
PF: predicated region fallthrough
CT: control target
= control target key end

     0   :  { %s1773_s18 = smov 0   ;;  %s2277_s0 = inlined_call_operand.vmem [shape: f32[512,16], index: 0, kind: input, shape index: {}]   ;;  %s2278_s1 = inlined_call_operand.vmem [shape: f32[16,32], index: 1, kind: input, shape index: {}]   ;;  %s2279_s2 = inlined_call_operand.vmem [shape: f32[1,32], index: 2, kind: input, shape index: {}]   ;;  %s2280_s3 = inlined_call_operand.vmem [shape: f32[32,128], index: 3, kind: input, shape index: {}]   ;;  %s2281_s4 = inlined_call_operand.vmem [shape: f32[1,128], index: 4, kind: input, shape index: {}]   ;;  %s2282_s5 = inlined_call_operand.vmem [shape: f32[512,128], index: 5, kind: output, shape index: {}]  }
   0x1 LB: > { %s1332_s19 = sadd.s32 4294967295, %s1741_s18   ;;  %p1336_p0 = scmp.ge.s32.totalorder %s1741_s18, 1  ;;  %s1741_s18 = sphi %s1773_s18, %s15_s18  }
   0x2   : > { %p188_p1 = scmp.lt.s32.totalorder %s1741_s18, 3 }
   0x4   : > { %p189_p2 = pnand %p1336_p0, %p188_p1 }
   0x5   : > { %v260_v0 = vld [vmem:[%s2278_s1] sm:$0xff] (!%p189_p2)  ;;  %v261_v1 = vld [vmem:[%s2278_s1 + $0x8] sm:$0xff] (!%p189_p2)  ;;  %s1337_s24 = sshll.u32 (!%p189_p2), %s1332_s19, 5  ;;  %vm269_vm0 = vcmask (!%p189_p2), 130048   ;;  %v625_v38 = vld [vmem:[%s2280_s3 + $0x10] sm:$0xff] (!%p189_p2)  ;;  %vm634_vm1 = vcmask (!%p189_p2), 261120  }
   0x6   : > { %192 = sbr.rel (%p189_p2) target bundleno = 828 (0x33c), region = 40  ;;  %v623_v2 = vld [vmem:[%s2280_s3] sm:$0xff] (!%p189_p2)  ;;  %v1587_v3 = vpack.c.bf16 (!%p189_p2), %v261_v1, %v260_v0  ;;  %p217_p3 = scmp.lt.s32.totalorder (!%p189_p2), %s1337_s24, 63  ;;  %v624_v4 = vld [vmem:[%s2280_s3 + $0x8] sm:$0xff] (!%p189_p2)  ;;  %v626_v39 = vld [vmem:[%s2280_s3 + $0x18] sm:$0xff] (!%p189_p2) }
   0x7   : > { %v1591_v5 = vpack.c.bf16 (!%p189_p2), %v624_v4, %v623_v2  ;;  %v1595_v40 = vpack.c.bf16 (!%p189_p2), %v626_v39, %v625_v38  ;;  %v1876_v41 = vld [vmem:[%s2279_s2] ss:$0 sm:$0xff] (!%p189_p2) }
   0x8   : > { %1588 = vmatprep.subr.bf16.mxu0 (!%p189_p2), %v1587_v3 }
   0x9   : > { %1590 = vmatpush3.bf16.msra.mxu0 (!%p189_p2), %v1587_v3  ;;  %1592 = vmatprep.subr.bf16.mxu1 (!%p189_p2), %v1591_v5 }
   0xa   : > { %1594 = vmatpush3.bf16.msra.mxu1 (!%p189_p2), %v1591_v5 }
   0xb   : > { %1596 = vmatprep.subr.bf16.mxu1 (!%p189_p2), %v1595_v40 }
   0xd   : > { %s2284_s24 = smov (!%p217_p3, %s1337_s24), 63 }
   0xe   : > { %s1338_s29 = sshll.u32 %s2284_s24, 3  ;;  %1598 = vmatpush3.bf16.msra.mxu1 %v1595_v40 }
   0xf   : > { %s1801_s7 = scalar_lea.vmem %s2277_s0, %s1338_s29  ;;  %s2208_s19 = scalar_lea.vmem %s2282_s5, %s1338_s29 }
  0x10   : > { %v228_v6 = vld [vmem:[%s1801_s7] sm:$0xff]  ;;  %v229_v7 = vld [vmem:[%s1801_s7 + $0x8] sm:$0xff]  ;;  %v230_v8 = vld [vmem:[%s1801_s7 + $0x10] sm:$0xff] }
  0x11   : > { %1483 = vmatprep.mubr.msk.f32.mxu0 %vm269_vm0, %v228_v6  ;;  %v231_v9 = vld [vmem:[%s1801_s7 + $0x18] sm:$0xff]  ;;  %v232_v10 = vld [vmem:[%s1801_s7 + $0x20] sm:$0xff]  ;;  %v233_v11 = vld [vmem:[%s1801_s7 + $0x28] sm:$0xff] }
  0x12   : > { %1484 = vmatmul.mubr.msk.f32.vlgmr.msra.gmra.mrb[0].mxu0 %vm269_vm0, %v229_v7  ;;  %v234_v12 = vld [vmem:[%s1801_s7 + $0x30] sm:$0xff]  ;;  %v235_v13 = vld [vmem:[%s1801_s7 + $0x38] sm:$0xff]  ;;  %v236_v14 = vld [vmem:[%s1801_s7 + $0x40] sm:$0xff] }
  0x13   : > { %1486 = vmatprep.mubr.msk.f32.mxu0 %vm269_vm0, %v230_v8  ;;  %v237_v15 = vld [vmem:[%s1801_s7 + $0x48] sm:$0xff]  ;;  %v238_v16 = vld [vmem:[%s1801_s7 + $0x50] sm:$0xff]  ;;  %v239_v17 = vld [vmem:[%s1801_s7 + $0x58] sm:$0xff] }
  0x14   : > { %v240_v18 = vld [vmem:[%s1801_s7 + $0x60] sm:$0xff]  ;;  %v241_v19 = vld [vmem:[%s1801_s7 + $0x68] sm:$0xff]  ;;  %v242_v20 = vld [vmem:[%s1801_s7 + $0x70] sm:$0xff] }
  0x15   : > { %v243_v21 = vld [vmem:[%s1801_s7 + $0x78] sm:$0xff]  ;;  %v244_v22 = vld [vmem:[%s1801_s7 + $0x80] sm:$0xff]  ;;  %v245_v23 = vld [vmem:[%s1801_s7 + $0x88] sm:$0xff] }
  0x16   : > { %1487 = vmatmul.mubr.msk.f32.gmra.mrb[2].mxu0 %vm269_vm0, %v231_v9  ;;  %v246_v24 = vld [vmem:[%s1801_s7 + $0x90] sm:$0xff]  ;;  %v247_v25 = vld [vmem:[%s1801_s7 + $0x98] sm:$0xff]  ;;  %v248_v26 = vld [vmem:[%s1801_s7 + $0xa0] sm:$0xff] }
  0x17   : > { %1489 = vmatprep.mubr.msk.f32.mxu0 %vm269_vm0, %v232_v10  ;;  %v249_v27 = vld [vmem:[%s1801_s7 + $0xa8] sm:$0xff]  ;;  %v250_v28 = vld [vmem:[%s1801_s7 + $0xb0] sm:$0xff]  ;;  %v251_v29 = vld [vmem:[%s1801_s7 + $0xb8] sm:$0xff] }
  0x18   : > { %v252_v30 = vld [vmem:[%s1801_s7 + $0xc0] sm:$0xff]  ;;  %v253_v31 = vld [vmem:[%s1801_s7 + $0xc8] sm:$0xff]  ;;  %v254_v32 = vld [vmem:[%s1801_s7 + $0xd0] sm:$0xff] }
  0x19   : > { %v255_v33 = vld [vmem:[%s1801_s7 + $0xd8] sm:$0xff]  ;;  %v256_v34 = vld [vmem:[%s1801_s7 + $0xe0] sm:$0xff]  ;;  %v257_v35 = vld [vmem:[%s1801_s7 + $0xe8] sm:$0xff] }
  0x1a   : > { %1490 = vmatmul.mubr.msk.f32.gmra.mrb[4].mxu0 %vm269_vm0, %v233_v11  ;;  %v258_v36 = vld [vmem:[%s1801_s7 + $0xf0] sm:$0xff]  ;;  %v259_v37 = vld [vmem:[%s1801_s7 + $0xf8] sm:$0xff] }
  0x1b   : > { %1492 = vmatprep.mubr.msk.f32.mxu0 %vm269_vm0, %v234_v12 }
  0x1e   : > { %1493 = vmatmul.mubr.msk.f32.gmra.mrb[6].mxu0 %vm269_vm0, %v235_v13 }
  0x1f   : > { %1495 = vmatprep.mubr.msk.f32.mxu0 %vm269_vm0, %v236_v14 }
  0x22   : > { %1496 = vmatmul.mubr.msk.f32.gmra.mrb[8].mxu0 %vm269_vm0, %v237_v15 }
  0x23   : > { %1498 = vmatprep.mubr.msk.f32.mxu0 %vm269_vm0, %v238_v16 }
  0x26   : > { %1499 = vmatmul.mubr.msk.f32.gmra.mrb[10].mxu0 %vm269_vm0, %v239_v17 }
  0x27   : > { %1501 = vmatprep.mubr.msk.f32.mxu0 %vm269_vm0, %v240_v18 }
  0x2a   : > { %1502 = vmatmul.mubr.msk.f32.gmra.mrb[12].mxu0 %vm269_vm0, %v241_v19 }
  0x2b   : > { %1504 = vmatprep.mubr.msk.f32.mxu0 %vm269_vm0, %v242_v20 }
  0x2e   : > { %1505 = vmatmul.mubr.msk.f32.gmra.mrb[14].mxu0 %vm269_vm0, %v243_v21 }
  0x2f   : > { %1507 = vmatprep.mubr.msk.f32.mxu0 %vm269_vm0, %v244_v22 }
  0x32   : > { %1508 = vmatmul.mubr.msk.f32.gmra.mrb[16].mxu0 %vm269_vm0, %v245_v23 }
  0x33   : > { %1510 = vmatprep.mubr.msk.f32.mxu0 %vm269_vm0, %v246_v24 }
  0x36   : > { %1511 = vmatmul.mubr.msk.f32.gmra.mrb[18].mxu0 %vm269_vm0, %v247_v25 }
  0x37   : > { %1513 = vmatprep.mubr.msk.f32.mxu0 %vm269_vm0, %v248_v26 }
  0x3a   : > { %1514 = vmatmul.mubr.msk.f32.gmra.mrb[20].mxu0 %vm269_vm0, %v249_v27 }
  0x3b   : > { %1516 = vmatprep.mubr.msk.f32.mxu0 %vm269_vm0, %v250_v28 }
  0x3e   : > { %1517 = vmatmul.mubr.msk.f32.gmra.mrb[22].mxu0 %vm269_vm0, %v251_v29 }
  0x3f   : > { %1519 = vmatprep.mubr.msk.f32.mxu0 %vm269_vm0, %v252_v30 }
  0x42   : > { %1520 = vmatmul.mubr.msk.f32.gmra.mrb[24].mxu0 %vm269_vm0, %v253_v31 }
  0x43   : > { %1522 = vmatprep.mubr.msk.f32.mxu0 %vm269_vm0, %v254_v32 }
  0x46   : > { %1523 = vmatmul.mubr.msk.f32.gmra.mrb[26].mxu0 %vm269_vm0, %v255_v33 }
  0x47   : > { %1525 = vmatprep.mubr.msk.f32.mxu0 %vm269_vm0, %v256_v34 }
  0x4a   : > { %1526 = vmatmul.mubr.msk.f32.gmra.mrb[28].mxu0 %vm269_vm0, %v257_v35 }
  0x4b   : > { %1528 = vmatprep.mubr.msk.f32.mxu0 %vm269_vm0, %v258_v36 }
  0x4e   : > { %1529 = vmatmul.mubr.msk.f32.gmra.mrb[30].mxu0 %vm269_vm0, %v259_v37 }
  0xe5   : > { %v1485_v42 = vpop.f32.mrb[0].mxu0 }
  0xe6   : > { %v438_v43 = vadd.f32 %v1485_v42, %v1876_v41  ;;  %v432_v44 = vpop.f32.mrb[1].mxu0 }
  0xe7   : > { %v433_v45 = vadd.f32 %v1876_v41, %v432_v44 }
  0xe8   : > { %v592_v48 = vmax.f32 %v438_v43, 0.0 }
  0xe9   : > { %v591_v46 = vmax.f32 %v433_v45, 0.0  ;;  %v1488_v47 = vpop.f32.mrb[2].mxu0 }
  0xea   : > { %v448_v49 = vadd.f32 %v1488_v47, %v1876_v41  ;;  %v442_v50 = vpop.f32.mrb[3].mxu0 }
  0xeb   : > { %v443_v51 = vadd.f32 %v1876_v41, %v442_v50  ;;  %1539 = vmatprep.mubr.msk.f32.mxu1 %vm634_vm1, %v591_v46 }
  0xec   : > { %1540 = vmatmul.mubr.msk.f32.vlgmr.msra.gmra.mrb[0].mxu1 %vm634_vm1, %v592_v48  ;;  %v594_v54 = vmax.f32 %v448_v49, 0.0 }
  0xed   : > { %v593_v52 = vmax.f32 %v443_v51, 0.0  ;;  %v1491_v53 = vpop.f32.mrb[4].mxu0 }
  0xee   : > { %v458_v55 = vadd.f32 %v1491_v53, %v1876_v41  ;;  %v452_v56 = vpop.f32.mrb[5].mxu0 }
  0xef   : > { %v453_v57 = vadd.f32 %v1876_v41, %v452_v56  ;;  %1542 = vmatprep.mubr.msk.f32.mxu1 %vm634_vm1, %v593_v52 }
  0xf0   : > { %v596_v58 = vmax.f32 %v458_v55, 0.0  ;;  %1543 = vmatmul.mubr.msk.f32.gmra.mrb[2].mxu1 %vm634_vm1, %v594_v54 }
  0xf1   : > { %v595_v59 = vmax.f32 %v453_v57, 0.0  ;;  %v1494_v60 = vpop.f32.mrb[6].mxu0 }
  0xf2   : > { %v468_v61 = vadd.f32 %v1494_v60, %v1876_v41  ;;  %v462_v62 = vpop.f32.mrb[7].mxu0 }
  0xf3   : > { %v463_v63 = vadd.f32 %v1876_v41, %v462_v62  ;;  %1545 = vmatprep.mubr.msk.f32.mxu1 %vm634_vm1, %v595_v59 }
  0xf4   : > { %v598_v0 = vmax.f32 %v468_v61, 0.0  ;;  %1546 = vmatmul.mubr.msk.f32.gmra.mrb[4].mxu1 %vm634_vm1, %v596_v58 }
  0xf5   : > { %v597_v1 = vmax.f32 %v463_v63, 0.0  ;;  %v1497_v2 = vpop.f32.mrb[8].mxu0 }
  0xf6   : > { %v478_v3 = vadd.f32 %v1497_v2, %v1876_v41  ;;  %v472_v4 = vpop.f32.mrb[9].mxu0 }
  0xf7   : > { %v473_v5 = vadd.f32 %v1876_v41, %v472_v4  ;;  %1548 = vmatprep.mubr.msk.f32.mxu1 %vm634_vm1, %v597_v1 }
  0xf8   : > { %v600_v6 = vmax.f32 %v478_v3, 0.0  ;;  %1549 = vmatmul.mubr.msk.f32.gmra.mrb[6].mxu1 %vm634_vm1, %v598_v0 }
  0xf9   : > { %v599_v7 = vmax.f32 %v473_v5, 0.0  ;;  %v1500_v8 = vpop.f32.mrb[10].mxu0 }
  0xfa   : > { %v488_v9 = vadd.f32 %v1500_v8, %v1876_v41  ;;  %v482_v10 = vpop.f32.mrb[11].mxu0 }
  0xfb   : > { %v483_v11 = vadd.f32 %v1876_v41, %v482_v10  ;;  %1551 = vmatprep.mubr.msk.f32.mxu1 %vm634_vm1, %v599_v7 }
  0xfc   : > { %v602_v12 = vmax.f32 %v488_v9, 0.0  ;;  %1552 = vmatmul.mubr.msk.f32.gmra.mrb[8].mxu1 %vm634_vm1, %v600_v6 }
  0xfd   : > { %v601_v13 = vmax.f32 %v483_v11, 0.0  ;;  %v1503_v14 = vpop.f32.mrb[12].mxu0  ;;  %v1945_v11 = vld [vmem:[%s2281_s4] ss:$0 sm:$0xff] }
  0xfe   : > { %v498_v15 = vadd.f32 %v1503_v14, %v1876_v41  ;;  %v492_v16 = vpop.f32.mrb[13].mxu0 }
  0xff   : > { %v493_v17 = vadd.f32 %v1876_v41, %v492_v16  ;;  %1554 = vmatprep.mubr.msk.f32.mxu1 %vm634_vm1, %v601_v13 }
 0x100   : > { %v604_v18 = vmax.f32 %v498_v15, 0.0  ;;  %1555 = vmatmul.mubr.msk.f32.gmra.mrb[10].mxu1 %vm634_vm1, %v602_v12 }
 0x101   : > { %v603_v19 = vmax.f32 %v493_v17, 0.0  ;;  %v1506_v20 = vpop.f32.mrb[14].mxu0 }
 0x102   : > { %v508_v21 = vadd.f32 %v1506_v20, %v1876_v41  ;;  %v502_v22 = vpop.f32.mrb[15].mxu0 }
 0x103   : > { %v503_v23 = vadd.f32 %v1876_v41, %v502_v22  ;;  %1557 = vmatprep.mubr.msk.f32.mxu1 %vm634_vm1, %v603_v19 }
 0x104   : > { %v606_v24 = vmax.f32 %v508_v21, 0.0  ;;  %1558 = vmatmul.mubr.msk.f32.gmra.mrb[12].mxu1 %vm634_vm1, %v604_v18 }
 0x105   : > { %v605_v25 = vmax.f32 %v503_v23, 0.0  ;;  %v1509_v26 = vpop.f32.mrb[16].mxu0 }
 0x106   : > { %v518_v27 = vadd.f32 %v1509_v26, %v1876_v41  ;;  %v512_v28 = vpop.f32.mrb[17].mxu0 }
 0x107   : > { %v513_v29 = vadd.f32 %v1876_v41, %v512_v28  ;;  %1560 = vmatprep.mubr.msk.f32.mxu1 %vm634_vm1, %v605_v25 }
 0x108   : > { %v608_v30 = vmax.f32 %v518_v27, 0.0  ;;  %1561 = vmatmul.mubr.msk.f32.gmra.mrb[14].mxu1 %vm634_vm1, %v606_v24 }
 0x109   : > { %v607_v31 = vmax.f32 %v513_v29, 0.0  ;;  %v1512_v32 = vpop.f32.mrb[18].mxu0 }
 0x10a   : > { %v528_v33 = vadd.f32 %v1512_v32, %v1876_v41  ;;  %v522_v34 = vpop.f32.mrb[19].mxu0 }
 0x10b   : > { %v523_v35 = vadd.f32 %v1876_v41, %v522_v34  ;;  %1563 = vmatprep.mubr.msk.f32.mxu1 %vm634_vm1, %v607_v31 }
 0x10c   : > { %v610_v36 = vmax.f32 %v528_v33, 0.0  ;;  %1564 = vmatmul.mubr.msk.f32.gmra.mrb[16].mxu1 %vm634_vm1, %v608_v30 }
 0x10d   : > { %v609_v37 = vmax.f32 %v523_v35, 0.0  ;;  %v1515_v38 = vpop.f32.mrb[20].mxu0 }
 0x10e   : > { %v538_v39 = vadd.f32 %v1515_v38, %v1876_v41  ;;  %v532_v40 = vpop.f32.mrb[21].mxu0 }
 0x10f   : > { %v533_v42 = vadd.f32 %v1876_v41, %v532_v40  ;;  %1566 = vmatprep.mubr.msk.f32.mxu1 %vm634_vm1, %v609_v37 }
 0x110   : > { %v612_v43 = vmax.f32 %v538_v39, 0.0  ;;  %1567 = vmatmul.mubr.msk.f32.gmra.mrb[18].mxu1 %vm634_vm1, %v610_v36 }
 0x111   : > { %v611_v44 = vmax.f32 %v533_v42, 0.0  ;;  %v1518_v45 = vpop.f32.mrb[22].mxu0 }
 0x112   : > { %v548_v46 = vadd.f32 %v1518_v45, %v1876_v41  ;;  %v542_v47 = vpop.f32.mrb[23].mxu0 }
 0x113   : > { %v543_v48 = vadd.f32 %v1876_v41, %v542_v47  ;;  %1569 = vmatprep.mubr.msk.f32.mxu1 %vm634_vm1, %v611_v44 }
 0x114   : > { %v614_v49 = vmax.f32 %v548_v46, 0.0  ;;  %1570 = vmatmul.mubr.msk.f32.gmra.mrb[20].mxu1 %vm634_vm1, %v612_v43 }
 0x115   : > { %v613_v50 = vmax.f32 %v543_v48, 0.0  ;;  %v1521_v51 = vpop.f32.mrb[24].mxu0 }
 0x116   : > { %v558_v52 = vadd.f32 %v1521_v51, %v1876_v41  ;;  %v552_v53 = vpop.f32.mrb[25].mxu0 }
 0x117   : > { %v553_v54 = vadd.f32 %v1876_v41, %v552_v53  ;;  %1572 = vmatprep.mubr.msk.f32.mxu1 %vm634_vm1, %v613_v50 }
 0x118   : > { %v616_v55 = vmax.f32 %v558_v52, 0.0  ;;  %1573 = vmatmul.mubr.msk.f32.gmra.mrb[22].mxu1 %vm634_vm1, %v614_v49 }
 0x119   : > { %v615_v56 = vmax.f32 %v553_v54, 0.0  ;;  %v1524_v57 = vpop.f32.mrb[26].mxu0 }
 0x11a   : > { %v568_v58 = vadd.f32 %v1524_v57, %v1876_v41  ;;  %v562_v59 = vpop.f32.mrb[27].mxu0 }
 0x11b   : > { %v563_v60 = vadd.f32 %v1876_v41, %v562_v59  ;;  %1575 = vmatprep.mubr.msk.f32.mxu1 %vm634_vm1, %v615_v56 }
 0x11c   : > { %v618_v61 = vmax.f32 %v568_v58, 0.0  ;;  %1576 = vmatmul.mubr.msk.f32.gmra.mrb[24].mxu1 %vm634_vm1, %v616_v55 }
 0x11d   : > { %v617_v62 = vmax.f32 %v563_v60, 0.0  ;;  %v1527_v63 = vpop.f32.mrb[28].mxu0 }
 0x11e   : > { %v578_v0 = vadd.f32 %v1527_v63, %v1876_v41  ;;  %v572_v1 = vpop.f32.mrb[29].mxu0 }
 0x11f   : > { %v573_v2 = vadd.f32 %v1876_v41, %v572_v1  ;;  %1578 = vmatprep.mubr.msk.f32.mxu1 %vm634_vm1, %v617_v62 }
 0x120   : > { %v620_v3 = vmax.f32 %v578_v0, 0.0  ;;  %1579 = vmatmul.mubr.msk.f32.gmra.mrb[26].mxu1 %vm634_vm1, %v618_v61 }
 0x121   : > { %v619_v4 = vmax.f32 %v573_v2, 0.0  ;;  %v1530_v5 = vpop.f32.mrb[30].mxu0 }
 0x122   : > { %v588_v6 = vadd.f32 %v1530_v5, %v1876_v41  ;;  %v582_v7 = vpop.f32.mrb[31].mxu0 }
 0x123   : > { %v583_v8 = vadd.f32 %v1876_v41, %v582_v7  ;;  %1581 = vmatprep.mubr.msk.f32.mxu1 %vm634_vm1, %v619_v4 }
 0x124   : > { %v622_v9 = vmax.f32 %v588_v6, 0.0  ;;  %1582 = vmatmul.mubr.msk.f32.gmra.mrb[28].mxu1 %vm634_vm1, %v620_v3 }
 0x125   : > { %v621_v10 = vmax.f32 %v583_v8, 0.0 }
 0x127   : > { %1584 = vmatprep.mubr.msk.f32.mxu1 %vm634_vm1, %v621_v10 }
 0x128   : > { %1585 = vmatmul.mubr.msk.f32.gmra.mrb[30].mxu1 %vm634_vm1, %v622_v9 }
 0x1bf   : > { %v1541_v12 = vpop.f32.mrb[0].mxu1 }
 0x1c0   : > { %v1948_v13 = vadd.f32 %v1541_v12, %v1945_v11  ;;  %v797_v41 = vpop.f32.mrb[1].mxu1 }
 0x1c1   : > { %v1952_v15 = vadd.f32 %v1945_v11, %v797_v41 }
 0x1c2   : > { %958 = vmax.xlane.f32.xlu0 %v1948_v13 }
 0x1c3   : > { %v1544_v14 = vpop.f32.mrb[2].mxu1 }
 0x1c4   : > { %v1955_v16 = vadd.f32 %v1544_v14, %v1945_v11  ;;  %v807_v17 = vpop.f32.mrb[3].mxu1 }
 0x1c5   : > { %v1960_v19 = vadd.f32 %v1945_v11, %v807_v17 }
 0x1c6   : > { %962 = vmax.xlane.f32.xlu1 %v1955_v16  ;;  %956 = vmax.xlane.f32.xlu0 %v1952_v15 }
 0x1c7   : > { %v1547_v18 = vpop.f32.mrb[4].mxu1 }
 0x1c8   : > { %v817_v20 = vpop.f32.mrb[5].mxu1  ;;  %v1968_v23 = vadd.f32 %v1547_v18, %v1945_v11 }
 0x1c9   : > { %v1963_v21 = vadd.f32 %v1945_v11, %v817_v20 }
 0x1ca   : > { %960 = vmax.xlane.f32.xlu1 %v1960_v19 }
 0x1cb   : > { %v1550_v22 = vpop.f32.mrb[6].mxu1  ;;  %964 = vmax.xlane.f32.xlu0 %v1963_v21 }
 0x1cc   : > { %v827_v24 = vpop.f32.mrb[7].mxu1  ;;  %v1976_v27 = vadd.f32 %v1550_v22, %v1945_v11 }
 0x1cd   : > { %v1971_v25 = vadd.f32 %v1945_v11, %v827_v24 }
 0x1ce   : > { %966 = vmax.xlane.f32.xlu1 %v1968_v23 }
 0x1cf   : > { %v1553_v26 = vpop.f32.mrb[8].mxu1  ;;  %968 = vmax.xlane.f32.xlu0 %v1971_v25 }
 0x1d0   : > { %v837_v28 = vpop.f32.mrb[9].mxu1  ;;  %v1984_v31 = vadd.f32 %v1553_v26, %v1945_v11 }
 0x1d1   : > { %v1979_v29 = vadd.f32 %v1945_v11, %v837_v28 }
 0x1d2   : > { %970 = vmax.xlane.f32.xlu1 %v1976_v27 }
 0x1d3   : > { %v1556_v30 = vpop.f32.mrb[10].mxu1  ;;  %972 = vmax.xlane.f32.xlu0 %v1979_v29 }
 0x1d4   : > { %v847_v32 = vpop.f32.mrb[11].mxu1  ;;  %v1992_v35 = vadd.f32 %v1556_v30, %v1945_v11 }
 0x1d5   : > { %v1987_v33 = vadd.f32 %v1945_v11, %v847_v32 }
 0x1d6   : > { %974 = vmax.xlane.f32.xlu1 %v1984_v31 }
 0x1d7   : > { %v1559_v34 = vpop.f32.mrb[12].mxu1  ;;  %976 = vmax.xlane.f32.xlu0 %v1987_v33 }
 0x1d8   : > { %v857_v36 = vpop.f32.mrb[13].mxu1  ;;  %v2000_v39 = vadd.f32 %v1559_v34, %v1945_v11 }
 0x1d9   : > { %v1995_v37 = vadd.f32 %v1945_v11, %v857_v36 }
 0x1da   : > { %978 = vmax.xlane.f32.xlu1 %v1992_v35 }
 0x1db   : > { %v1562_v38 = vpop.f32.mrb[14].mxu1  ;;  %980 = vmax.xlane.f32.xlu0 %v1995_v37 }
 0x1dc   : > { %v867_v40 = vpop.f32.mrb[15].mxu1  ;;  %v2008_v44 = vadd.f32 %v1562_v38, %v1945_v11 }
 0x1dd   : > { %v2003_v42 = vadd.f32 %v1945_v11, %v867_v40 }
 0x1de   : > { %982 = vmax.xlane.f32.xlu1 %v2000_v39 }
 0x1df   : > { %v1565_v43 = vpop.f32.mrb[16].mxu1  ;;  %984 = vmax.xlane.f32.xlu0 %v2003_v42 }
 0x1e0   : > { %v877_v45 = vpop.f32.mrb[17].mxu1  ;;  %v2016_v48 = vadd.f32 %v1565_v43, %v1945_v11 }
 0x1e1   : > { %v2011_v46 = vadd.f32 %v1945_v11, %v877_v45 }
 0x1e2   : > { %986 = vmax.xlane.f32.xlu1 %v2008_v44 }
 0x1e3   : > { %v1568_v47 = vpop.f32.mrb[18].mxu1  ;;  %988 = vmax.xlane.f32.xlu0 %v2011_v46 }
 0x1e4   : > { %v887_v49 = vpop.f32.mrb[19].mxu1  ;;  %v2024_v52 = vadd.f32 %v1568_v47, %v1945_v11 }
 0x1e5   : > { %v2019_v50 = vadd.f32 %v1945_v11, %v887_v49 }
 0x1e6   : > { %990 = vmax.xlane.f32.xlu1 %v2016_v48 }
 0x1e7   : > { %v1571_v51 = vpop.f32.mrb[20].mxu1  ;;  %992 = vmax.xlane.f32.xlu0 %v2019_v50 }
 0x1e8   : > { %v897_v53 = vpop.f32.mrb[21].mxu1  ;;  %v2032_v56 = vadd.f32 %v1571_v51, %v1945_v11 }
 0x1e9   : > { %v2027_v54 = vadd.f32 %v1945_v11, %v897_v53 }
 0x1ea   : > { %994 = vmax.xlane.f32.xlu1 %v2024_v52 }
 0x1eb   : > { %v1574_v55 = vpop.f32.mrb[22].mxu1  ;;  %996 = vmax.xlane.f32.xlu0 %v2027_v54 }
 0x1ec   : > { %v907_v57 = vpop.f32.mrb[23].mxu1  ;;  %v2040_v60 = vadd.f32 %v1574_v55, %v1945_v11 }
 0x1ed   : > { %v2035_v58 = vadd.f32 %v1945_v11, %v907_v57 }
 0x1ee   : > { %998 = vmax.xlane.f32.xlu1 %v2032_v56 }
 0x1ef   : > { %v1577_v59 = vpop.f32.mrb[24].mxu1  ;;  %1000 = vmax.xlane.f32.xlu0 %v2035_v58 }
 0x1f0   : > { %v917_v61 = vpop.f32.mrb[25].mxu1  ;;  %v2048_v0 = vadd.f32 %v1577_v59, %v1945_v11 }
 0x1f1   : > { %v2043_v62 = vadd.f32 %v1945_v11, %v917_v61 }
 0x1f2   : > { %1002 = vmax.xlane.f32.xlu1 %v2040_v60 }
 0x1f3   : > { %v1580_v63 = vpop.f32.mrb[26].mxu1  ;;  %1004 = vmax.xlane.f32.xlu0 %v2043_v62 }
 0x1f4   : > { %v927_v1 = vpop.f32.mrb[27].mxu1  ;;  %v2056_v4 = vadd.f32 %v1580_v63, %v1945_v11 }
 0x1f5   : > { %v2051_v2 = vadd.f32 %v1945_v11, %v927_v1 }
 0x1f6   : > { %1006 = vmax.xlane.f32.xlu1 %v2048_v0 }
 0x1f7   : > { %v1583_v3 = vpop.f32.mrb[28].mxu1  ;;  %1008 = vmax.xlane.f32.xlu0 %v2051_v2 }
 0x1f8   : > { %v937_v5 = vpop.f32.mrb[29].mxu1  ;;  %v2064_v8 = vadd.f32 %v1583_v3, %v1945_v11 }
 0x1f9   : > { %v2059_v6 = vadd.f32 %v1945_v11, %v937_v5 }
 0x1fa   : > { %1010 = vmax.xlane.f32.xlu1 %v2056_v4 }
 0x1fb   : > { %v1586_v7 = vpop.f32.mrb[30].mxu1  ;;  %1012 = vmax.xlane.f32.xlu0 %v2059_v6 }
 0x1fc   : > { %v2067_v9 = vadd.f32 %v1586_v7, %v1945_v11  ;;  %v947_v10 = vpop.f32.mrb[31].mxu1 }
 0x1fd   : > { %v2070_v12 = vadd.f32 %v1945_v11, %v947_v10 }
 0x1fe   : > { %1014 = vmax.xlane.f32.xlu1 %v2064_v8 }
 0x1ff   : > { %1016 = vmax.xlane.f32.xlu0 %v2070_v12 }
 0x202   : > { %1018 = vmax.xlane.f32.xlu1 %v2067_v9 }
 0x24f   : > { %v959_v41 = vpop.xlane.xlu0 %958 }
 0x250   : > { %v1021_v14 = vsub.f32 %v1948_v13, %v959_v41 }
 0x252   : > { %v1054_v17 = vmul.f32 1.442695, %v1021_v14 }
 0x253   : > { %v963_v18 = vpop.xlane.xlu1 %962  ;;  %v957_v20 = vpop.xlane.xlu0 %956 }
 0x254   : > { %1607 = vpow2.f32 %v1054_v17  ;;  %v1023_v22 = vsub.f32 %v1955_v16, %v963_v18  ;;  %v1020_v24 = vsub.f32 %v1952_v15, %v957_v20 }
 0x256   : > { %v1058_v26 = vmul.f32 1.442695, %v1023_v22  ;;  %v1052_v11 = vmul.f32 1.442695, %v1020_v24 }
 0x257   : > { %v961_v28 = vpop.xlane.xlu1 %960 }
 0x258   : > { %1609 = vpow2.f32 %v1058_v26  ;;  %v1022_v30 = vsub.f32 %v1960_v19, %v961_v28  ;;  %v965_v32 = vpop.xlane.xlu0 %964 }
 0x259   : > { %1611 = vpow2.f32 %v1052_v11  ;;  %v1024_v34 = vsub.f32 %v1963_v21, %v965_v32 }
 0x25a   : > { %v1056_v36 = vmul.f32 1.442695, %v1022_v30 }
 0x25b   : > { %v967_v13 = vpop.xlane.xlu1 %966  ;;  %v1060_v43 = vmul.f32 1.442695, %v1024_v34 }
 0x25c   : > { %1613 = vpow2.f32 %v1056_v36  ;;  %v1025_v38 = vsub.f32 %v1968_v23, %v967_v13  ;;  %v969_v40 = vpop.xlane.xlu0 %968 }
 0x25d   : > { %v1026_v16 = vsub.f32 %v1971_v25, %v969_v40 }
 0x25e   : > { %v2082_v15 = vpop.eup %1607  ;;  %v1062_v45 = vmul.f32 1.442695, %v1025_v38 }
 0x25f   : > { %1118 = vadd.xlane.f32.xlu1 %v2082_v15  ;;  %v971_v47 = vpop.xlane.xlu1 %970  ;;  %v1064_v21 = vmul.f32 1.442695, %v1026_v16 }
 0x260   : > { %1615 = vpow2.f32 %v1062_v45  ;;  %v1027_v19 = vsub.f32 %v1976_v27, %v971_v47  ;;  %v973_v49 = vpop.xlane.xlu0 %972 }
 0x261   : > { %1617 = vpow2.f32 %v1060_v43  ;;  %v1028_v51 = vsub.f32 %v1979_v29, %v973_v49 }
 0x262   : > { %v2087_v53 = vpop.eup %1609  ;;  %v1066_v23 = vmul.f32 1.442695, %v1027_v19 }
 0x263   : > { %v2089_v55 = vpop.eup %1611  ;;  %1122 = vadd.xlane.f32.xlu1 %v2087_v53  ;;  %v975_v25 = vpop.xlane.xlu1 %974  ;;  %v1068_v27 = vmul.f32 1.442695, %v1028_v51 }
 0x264   : > { %1619 = vpow2.f32 %v1066_v23  ;;  %v1029_v57 = vsub.f32 %v1984_v31, %v975_v25  ;;  %1116 = vadd.xlane.f32.xlu0 %v2089_v55  ;;  %v977_v59 = vpop.xlane.xlu0 %976 }
 0x265   : > { %1621 = vpow2.f32 %v1064_v21  ;;  %v1030_v61 = vsub.f32 %v1987_v33, %v977_v59 }
 0x266   : > { %v2095_v63 = vpop.eup %1613  ;;  %v1070_v29 = vmul.f32 1.442695, %v1029_v57 }
 0x267   : > { %v979_v1 = vpop.xlane.xlu1 %978  ;;  %v1072_v7 = vmul.f32 1.442695, %v1030_v61 }
 0x268   : > { %1623 = vpow2.f32 %v1070_v29  ;;  %v1031_v3 = vsub.f32 %v1992_v35, %v979_v1  ;;  %1120 = vadd.xlane.f32.xlu0 %v2095_v63  ;;  %v981_v5 = vpop.xlane.xlu0 %980 }
 0x269   : > { %1625 = vpow2.f32 %v1068_v27  ;;  %v1032_v31 = vsub.f32 %v1995_v37, %v981_v5 }
 0x26a   : > { %v2100_v10 = vpop.eup %1615  ;;  %v1074_v41 = vmul.f32 1.442695, %v1031_v3 }
 0x26b   : > { %v2102_v14 = vpop.eup %1617  ;;  %1126 = vadd.xlane.f32.xlu1 %v2100_v10  ;;  %v983_v33 = vpop.xlane.xlu1 %982  ;;  %v1076_v18 = vmul.f32 1.442695, %v1032_v31 }
 0x26c   : > { %1627 = vpow2.f32 %v1074_v41  ;;  %v1033_v17 = vsub.f32 %v2000_v39, %v983_v33  ;;  %1124 = vadd.xlane.f32.xlu0 %v2102_v14  ;;  %v985_v35 = vpop.xlane.xlu0 %984 }
 0x26d   : > { %1629 = vpow2.f32 %v1072_v7  ;;  %v1034_v20 = vsub.f32 %v2003_v42, %v985_v35 }
 0x26e   : > { %v2108_v22 = vpop.eup %1619  ;;  %v1078_v37 = vmul.f32 1.442695, %v1033_v17 }
 0x26f   : > { %v2110_v24 = vpop.eup %1621  ;;  %1130 = vadd.xlane.f32.xlu1 %v2108_v22  ;;  %v987_v26 = vpop.xlane.xlu1 %986  ;;  %v1080_v28 = vmul.f32 1.442695, %v1034_v20 }
 0x270   : > { %1631 = vpow2.f32 %v1078_v37  ;;  %v1035_v11 = vsub.f32 %v2008_v44, %v987_v26  ;;  %1128 = vadd.xlane.f32.xlu0 %v2110_v24  ;;  %v989_v39 = vpop.xlane.xlu0 %988 }
 0x271   : > { %1633 = vpow2.f32 %v1076_v18  ;;  %v1036_v30 = vsub.f32 %v2011_v46, %v989_v39 }
 0x272   : > { %v2116_v32 = vpop.eup %1623  ;;  %v1082_v42 = vmul.f32 1.442695, %v1035_v11 }
 0x273   : > { %v2118_v34 = vpop.eup %1625  ;;  %1134 = vadd.xlane.f32.xlu1 %v2116_v32  ;;  %v991_v36 = vpop.xlane.xlu1 %990  ;;  %v1084_v38 = vmul.f32 1.442695, %v1036_v30 }
 0x274   : > { %1635 = vpow2.f32 %v1082_v42  ;;  %v1037_v13 = vsub.f32 %v2016_v48, %v991_v36  ;;  %1132 = vadd.xlane.f32.xlu0 %v2118_v34  ;;  %v993_v44 = vpop.xlane.xlu0 %992 }
 0x275   : > { %1637 = vpow2.f32 %v1080_v28  ;;  %v1038_v40 = vsub.f32 %v2019_v50, %v993_v44 }
 0x276   : > { %v2124_v43 = vpop.eup %1627  ;;  %v1086_v46 = vmul.f32 1.442695, %v1037_v13 }
 0x277   : > { %v2126_v16 = vpop.eup %1629  ;;  %1138 = vadd.xlane.f32.xlu1 %v2124_v43  ;;  %v995_v45 = vpop.xlane.xlu1 %994  ;;  %v1088_v19 = vmul.f32 1.442695, %v1038_v40 }
 0x278   : > { %1639 = vpow2.f32 %v1086_v46  ;;  %v1039_v47 = vsub.f32 %v2024_v52, %v995_v45  ;;  %1136 = vadd.xlane.f32.xlu0 %v2126_v16  ;;  %v997_v48 = vpop.xlane.xlu0 %996 }
 0x279   : > { %1641 = vpow2.f32 %v1084_v38  ;;  %v1040_v49 = vsub.f32 %v2027_v54, %v997_v48 }
 0x27a   : > { %v2132_v21 = vpop.eup %1631  ;;  %v1090_v50 = vmul.f32 1.442695, %v1039_v47 }
 0x27b   : > { %v2134_v51 = vpop.eup %1633  ;;  %1142 = vadd.xlane.f32.xlu1 %v2132_v21  ;;  %v999_v23 = vpop.xlane.xlu1 %998  ;;  %v1092_v57 = vmul.f32 1.442695, %v1040_v49 }
 0x27c   : > { %1643 = vpow2.f32 %v1090_v50  ;;  %v1041_v25 = vsub.f32 %v2032_v56, %v999_v23  ;;  %1140 = vadd.xlane.f32.xlu0 %v2134_v51  ;;  %v1001_v52 = vpop.xlane.xlu0 %1000 }
 0x27d   : > { %1645 = vpow2.f32 %v1088_v19  ;;  %v1042_v59 = vsub.f32 %v2035_v58, %v1001_v52 }
 0x27e   : > { %v2140_v27 = vpop.eup %1635  ;;  %v1094_v54 = vmul.f32 1.442695, %v1041_v25 }
 0x27f   : > { %v2142_v61 = vpop.eup %1637  ;;  %1146 = vadd.xlane.f32.xlu1 %v2140_v27  ;;  %v1003_v29 = vpop.xlane.xlu1 %1002  ;;  %v1096_v3 = vmul.f32 1.442695, %v1042_v59 }
 0x280   : > { %1647 = vpow2.f32 %v1094_v54  ;;  %v1043_v1 = vsub.f32 %v2040_v60, %v1003_v29  ;;  %1144 = vadd.xlane.f32.xlu0 %v2142_v61  ;;  %v1005_v56 = vpop.xlane.xlu0 %1004 }
 0x281   : > { %1649 = vpow2.f32 %v1092_v57  ;;  %v1044_v5 = vsub.f32 %v2043_v62, %v1005_v56 }
 0x282   : > { %v2148_v7 = vpop.eup %1639  ;;  %v1098_v58 = vmul.f32 1.442695, %v1043_v1 }
 0x283   : > { %v2150_v31 = vpop.eup %1641  ;;  %1150 = vadd.xlane.f32.xlu1 %v2148_v7  ;;  %v1007_v41 = vpop.xlane.xlu1 %1006  ;;  %v1100_v17 = vmul.f32 1.442695, %v1044_v5 }
 0x284   : > { %1651 = vpow2.f32 %v1098_v58  ;;  %v1045_v33 = vsub.f32 %v2048_v0, %v1007_v41  ;;  %1148 = vadd.xlane.f32.xlu0 %v2150_v31  ;;  %v1009_v60 = vpop.xlane.xlu0 %1008 }
 0x285   : > { %1653 = vpow2.f32 %v1096_v3  ;;  %v1046_v35 = vsub.f32 %v2051_v2, %v1009_v60 }
 0x286   : > { %v2156_v18 = vpop.eup %1643  ;;  %v1102_v62 = vmul.f32 1.442695, %v1045_v33 }
 0x287   : > { %v2158_v20 = vpop.eup %1645  ;;  %1154 = vadd.xlane.f32.xlu1 %v2156_v18  ;;  %v1011_v37 = vpop.xlane.xlu1 %1010  ;;  %v1104_v11 = vmul.f32 1.442695, %v1046_v35 }
 0x288   : > { %1655 = vpow2.f32 %v1102_v62  ;;  %v1047_v26 = vsub.f32 %v2056_v4, %v1011_v37  ;;  %1152 = vadd.xlane.f32.xlu0 %v2158_v20  ;;  %v1013_v0 = vpop.xlane.xlu0 %1012 }
 0x289   : > { %1657 = vpow2.f32 %v1100_v17  ;;  %v1048_v39 = vsub.f32 %v2059_v6, %v1013_v0 }
 0x28a   : > { %v2164_v28 = vpop.eup %1647  ;;  %v1106_v2 = vmul.f32 1.442695, %v1047_v26 }
 0x28b   : > { %v2166_v30 = vpop.eup %1649  ;;  %1158 = vadd.xlane.f32.xlu1 %v2164_v28  ;;  %v1015_v42 = vpop.xlane.xlu1 %1014  ;;  %v1108_v13 = vmul.f32 1.442695, %v1048_v39 }
 0x28c   : > { %1659 = vpow2.f32 %v1106_v2  ;;  %v1049_v36 = vsub.f32 %v2064_v8, %v1015_v42  ;;  %1156 = vadd.xlane.f32.xlu0 %v2166_v30  ;;  %v1017_v4 = vpop.xlane.xlu0 %1016 }
 0x28d   : > { %1661 = vpow2.f32 %v1104_v11  ;;  %v1050_v44 = vsub.f32 %v2070_v12, %v1017_v4 }
 0x28e   : > { %v2172_v38 = vpop.eup %1651  ;;  %v1110_v6 = vmul.f32 1.442695, %v1049_v36 }
 0x28f   : > { %v2174_v40 = vpop.eup %1653  ;;  %1162 = vadd.xlane.f32.xlu1 %v2172_v38  ;;  %v1019_v46 = vpop.xlane.xlu1 %1018  ;;  %v1112_v8 = vmul.f32 1.442695, %v1050_v44 }
 0x290   : > { %1663 = vpow2.f32 %v1110_v6  ;;  %v1051_v45 = vsub.f32 %v2067_v9, %v1019_v46  ;;  %1160 = vadd.xlane.f32.xlu0 %v2174_v40 }
 0x291   : > { %1665 = vpow2.f32 %v1108_v13 }
 0x292   : > { %v2179_v47 = vpop.eup %1655  ;;  %v1114_v48 = vmul.f32 1.442695, %v1051_v45 }
 0x293   : > { %v2181_v19 = vpop.eup %1657  ;;  %1166 = vadd.xlane.f32.xlu1 %v2179_v47 }
 0x294   : > { %1667 = vpow2.f32 %v1114_v48  ;;  %1164 = vadd.xlane.f32.xlu0 %v2181_v19 }
 0x295   : > { %1669 = vpow2.f32 %v1112_v8 }
 0x296   : > { %v2185_v12 = vpop.eup %1659 }
 0x297   : > { %v2187_v49 = vpop.eup %1661  ;;  %1170 = vadd.xlane.f32.xlu1 %v2185_v12 }
 0x298   : > { %1168 = vadd.xlane.f32.xlu0 %v2187_v49 }
 0x29a   : > { %v2191_v9 = vpop.eup %1663 }
 0x29b   : > { %v2193_v50 = vpop.eup %1665  ;;  %1174 = vadd.xlane.f32.xlu1 %v2191_v9 }
 0x29c   : > { %1172 = vadd.xlane.f32.xlu0 %v2193_v50 }
 0x29e   : > { %v2197_v23 = vpop.eup %1667 }
 0x29f   : > { %v2199_v25 = vpop.eup %1669  ;;  %1178 = vadd.xlane.f32.xlu1 %v2197_v23 }
 0x2a0   : > { %1176 = vadd.xlane.f32.xlu0 %v2199_v25 }
 0x2ec   : > { %v1119_v52 = vpop.xlane.xlu1 %1118 }
 0x2ed   : > { %1671 = vrcp.f32 %v1119_v52 }
 0x2f0   : > { %v1123_v57 = vpop.xlane.xlu1 %1122 }
 0x2f1   : > { %1673 = vrcp.f32 %v1123_v57  ;;  %v1117_v59 = vpop.xlane.xlu0 %1116 }
 0x2f2   : > { %1675 = vrcp.f32 %v1117_v59 }
 0x2f5   : > { %v1121_v54 = vpop.xlane.xlu0 %1120 }
 0x2f6   : > { %1677 = vrcp.f32 %v1121_v54 }
 0x2f7   : > { %v1672_v29 = vpop.eup %1671 }
 0x2f8   : > { %v1183_v1 = vmul.f32 %v1672_v29, %v2082_v15  ;;  %v1127_v56 = vpop.xlane.xlu1 %1126 }
 0x2f9   : > { %1679 = vrcp.f32 %v1127_v56  ;;  %v1125_v3 = vpop.xlane.xlu0 %1124 }
 0x2fa   : > { %1245 = vst [vmem:[%s2208_s19 + $0x8] sm:$0xff] %v1183_v1  ;;  %1681 = vrcp.f32 %v1125_v3 }
 0x2fb   : > { %v1674_v5 = vpop.eup %1673 }
 0x2fc   : > { %v1676_v58 = vpop.eup %1675  ;;  %v1187_v41 = vmul.f32 %v1674_v5, %v2087_v53  ;;  %v1131_v33 = vpop.xlane.xlu1 %1130 }
 0x2fd   : > { %v1181_v60 = vmul.f32 %v1676_v58, %v2089_v55  ;;  %1683 = vrcp.f32 %v1131_v33  ;;  %v1129_v17 = vpop.xlane.xlu0 %1128 }
 0x2fe   : > { %1247 = vst [vmem:[%s2208_s19 + $0x18] sm:$0xff] %v1187_v41  ;;  %1685 = vrcp.f32 %v1129_v17 }
 0x2ff   : > { %1244 = vst [vmem:[%s2208_s19] sm:$0xff] %v1181_v60 }
 0x300   : > { %v1678_v15 = vpop.eup %1677  ;;  %v1135_v35 = vpop.xlane.xlu1 %1134 }
 0x301   : > { %v1185_v62 = vmul.f32 %v1678_v15, %v2095_v63  ;;  %1687 = vrcp.f32 %v1135_v35  ;;  %v1133_v37 = vpop.xlane.xlu0 %1132 }
 0x302   : > { %1689 = vrcp.f32 %v1133_v37 }
 0x303   : > { %v1680_v26 = vpop.eup %1679  ;;  %1246 = vst [vmem:[%s2208_s19 + $0x10] sm:$0xff] %v1185_v62 }
 0x304   : > { %v1682_v53 = vpop.eup %1681  ;;  %v1191_v55 = vmul.f32 %v1680_v26, %v2100_v10  ;;  %v1139_v0 = vpop.xlane.xlu1 %1138 }
 0x305   : > { %v1189_v11 = vmul.f32 %v1682_v53, %v2102_v14  ;;  %1691 = vrcp.f32 %v1139_v0  ;;  %v1137_v39 = vpop.xlane.xlu0 %1136 }
 0x306   : > { %1249 = vst [vmem:[%s2208_s19 + $0x28] sm:$0xff] %v1191_v55  ;;  %1693 = vrcp.f32 %v1137_v39 }
 0x307   : > { %v1684_v2 = vpop.eup %1683  ;;  %1248 = vst [vmem:[%s2208_s19 + $0x20] sm:$0xff] %v1189_v11 }
 0x308   : > { %v1686_v63 = vpop.eup %1685  ;;  %v1195_v42 = vmul.f32 %v1684_v2, %v2108_v22  ;;  %v1143_v36 = vpop.xlane.xlu1 %1142 }
 0x309   : > { %v1193_v4 = vmul.f32 %v1686_v63, %v2110_v24  ;;  %1695 = vrcp.f32 %v1143_v36  ;;  %v1141_v10 = vpop.xlane.xlu0 %1140 }
 0x30a   : > { %1251 = vst [vmem:[%s2208_s19 + $0x38] sm:$0xff] %v1195_v42  ;;  %1697 = vrcp.f32 %v1141_v10 }
 0x30b   : > { %v1688_v14 = vpop.eup %1687  ;;  %1250 = vst [vmem:[%s2208_s19 + $0x30] sm:$0xff] %v1193_v4 }
 0x30c   : > { %v1690_v13 = vpop.eup %1689  ;;  %v1199_v44 = vmul.f32 %v1688_v14, %v2116_v32  ;;  %v1147_v6 = vpop.xlane.xlu1 %1146 }
 0x30d   : > { %v1197_v46 = vmul.f32 %v1690_v13, %v2118_v34  ;;  %1699 = vrcp.f32 %v1147_v6  ;;  %v1145_v22 = vpop.xlane.xlu0 %1144 }
 0x30e   : > { %1253 = vst [vmem:[%s2208_s19 + $0x48] sm:$0xff] %v1199_v44  ;;  %1701 = vrcp.f32 %v1145_v22 }
 0x30f   : > { %v1692_v24 = vpop.eup %1691  ;;  %1252 = vst [vmem:[%s2208_s19 + $0x40] sm:$0xff] %v1197_v46 }
 0x310   : > { %v1694_v45 = vpop.eup %1693  ;;  %v1203_v8 = vmul.f32 %v1692_v24, %v2124_v43  ;;  %v1151_v48 = vpop.xlane.xlu1 %1150 }
 0x311   : > { %v1201_v52 = vmul.f32 %v1694_v45, %v2126_v16  ;;  %1703 = vrcp.f32 %v1151_v48  ;;  %v1149_v32 = vpop.xlane.xlu0 %1148 }
 0x312   : > { %1255 = vst [vmem:[%s2208_s19 + $0x58] sm:$0xff] %v1203_v8  ;;  %1705 = vrcp.f32 %v1149_v32 }
 0x313   : > { %v1696_v34 = vpop.eup %1695  ;;  %1254 = vst [vmem:[%s2208_s19 + $0x50] sm:$0xff] %v1201_v52 }
 0x314   : > { %v1698_v57 = vpop.eup %1697  ;;  %v1207_v59 = vmul.f32 %v1696_v34, %v2132_v21  ;;  %v1155_v54 = vpop.xlane.xlu1 %1154 }
 0x315   : > { %v1205_v29 = vmul.f32 %v1698_v57, %v2134_v51  ;;  %1707 = vrcp.f32 %v1155_v54  ;;  %v1153_v43 = vpop.xlane.xlu0 %1152 }
 0x316   : > { %1257 = vst [vmem:[%s2208_s19 + $0x68] sm:$0xff] %v1207_v59  ;;  %1709 = vrcp.f32 %v1153_v43 }
 0x317   : > { %v1700_v16 = vpop.eup %1699  ;;  %1256 = vst [vmem:[%s2208_s19 + $0x60] sm:$0xff] %v1205_v29 }
 0x318   : > { %v1702_v1 = vpop.eup %1701  ;;  %v1211_v56 = vmul.f32 %v1700_v16, %v2140_v27  ;;  %v1159_v3 = vpop.xlane.xlu1 %1158 }
 0x319   : > { %v1209_v5 = vmul.f32 %v1702_v1, %v2142_v61  ;;  %1711 = vrcp.f32 %v1159_v3  ;;  %v1157_v21 = vpop.xlane.xlu0 %1156 }
 0x31a   : > { %1259 = vst [vmem:[%s2208_s19 + $0x78] sm:$0xff] %v1211_v56  ;;  %1713 = vrcp.f32 %v1157_v21 }
 0x31b   : > { %v1704_v51 = vpop.eup %1703  ;;  %1258 = vst [vmem:[%s2208_s19 + $0x70] sm:$0xff] %v1209_v5 }
 0x31c   : > { %v1706_v58 = vpop.eup %1705  ;;  %v1215_v41 = vmul.f32 %v1704_v51, %v2148_v7  ;;  %v1163_v33 = vpop.xlane.xlu1 %1162 }
 0x31d   : > { %v1213_v60 = vmul.f32 %v1706_v58, %v2150_v31  ;;  %1715 = vrcp.f32 %v1163_v33  ;;  %v1161_v27 = vpop.xlane.xlu0 %1160 }
 0x31e   : > { %1261 = vst [vmem:[%s2208_s19 + $0x88] sm:$0xff] %v1215_v41  ;;  %1717 = vrcp.f32 %v1161_v27 }
 0x31f   : > { %v1708_v61 = vpop.eup %1707  ;;  %1260 = vst [vmem:[%s2208_s19 + $0x80] sm:$0xff] %v1213_v60 }
 0x320   : > { %v1710_v17 = vpop.eup %1709  ;;  %v1219_v15 = vmul.f32 %v1708_v61, %v2156_v18  ;;  %v1167_v35 = vpop.xlane.xlu1 %1166 }
 0x321   : > { %v1217_v62 = vmul.f32 %v1710_v17, %v2158_v20  ;;  %1719 = vrcp.f32 %v1167_v35  ;;  %v1165_v7 = vpop.xlane.xlu0 %1164 }
 0x322   : > { %1263 = vst [vmem:[%s2208_s19 + $0x98] sm:$0xff] %v1219_v15  ;;  %1721 = vrcp.f32 %v1165_v7 }
 0x323   : > { %v1712_v31 = vpop.eup %1711  ;;  %1262 = vst [vmem:[%s2208_s19 + $0x90] sm:$0xff] %v1217_v62 }
 0x324   : > { %v1714_v37 = vpop.eup %1713  ;;  %v1223_v26 = vmul.f32 %v1712_v31, %v2164_v28  ;;  %v1171_v53 = vpop.xlane.xlu1 %1170 }
 0x325   : > { %v1221_v55 = vmul.f32 %v1714_v37, %v2166_v30  ;;  %1723 = vrcp.f32 %v1171_v53  ;;  %v1169_v18 = vpop.xlane.xlu0 %1168 }
 0x326   : > { %1265 = vst [vmem:[%s2208_s19 + $0xa8] sm:$0xff] %v1223_v26  ;;  %1725 = vrcp.f32 %v1169_v18 }
 0x327   : > { %v1716_v20 = vpop.eup %1715  ;;  %1264 = vst [vmem:[%s2208_s19 + $0xa0] sm:$0xff] %v1221_v55 }
 0x328   : > { %v1718_v0 = vpop.eup %1717  ;;  %v1227_v11 = vmul.f32 %v1716_v20, %v2172_v38  ;;  %v1175_v39 = vpop.xlane.xlu1 %1174 }
 0x329   : > { %v1225_v2 = vmul.f32 %v1718_v0, %v2174_v40  ;;  %1727 = vrcp.f32 %v1175_v39  ;;  %v1173_v28 = vpop.xlane.xlu0 %1172 }
 0x32a   : > { %1267 = vst [vmem:[%s2208_s19 + $0xb8] sm:$0xff] %v1227_v11  ;;  %1729 = vrcp.f32 %v1173_v28 }
 0x32b   : > { %v1720_v30 = vpop.eup %1719  ;;  %1266 = vst [vmem:[%s2208_s19 + $0xb0] sm:$0xff] %v1225_v2 }
 0x32c   : > { %v1722_v63 = vpop.eup %1721  ;;  %v1231_v42 = vmul.f32 %v1720_v30, %v2179_v47  ;;  %v1179_v36 = vpop.xlane.xlu1 %1178 }
 0x32d   : > { %v1229_v4 = vmul.f32 %v1722_v63, %v2181_v19  ;;  %1731 = vrcp.f32 %v1179_v36  ;;  %v1177_v38 = vpop.xlane.xlu0 %1176 }
 0x32e   : > { %1269 = vst [vmem:[%s2208_s19 + $0xc8] sm:$0xff] %v1231_v42  ;;  %1733 = vrcp.f32 %v1177_v38 }
 0x32f   : > { %v1724_v40 = vpop.eup %1723  ;;  %1268 = vst [vmem:[%s2208_s19 + $0xc0] sm:$0xff] %v1229_v4 }
 0x330   : > { %v1726_v10 = vpop.eup %1725  ;;  %v1235_v14 = vmul.f32 %v1724_v40, %v2185_v12 }
 0x331   : > { %v1233_v13 = vmul.f32 %v1726_v10, %v2187_v49 }
 0x332   : > { %1271 = vst [vmem:[%s2208_s19 + $0xd8] sm:$0xff] %v1235_v14 }
 0x333   : > { %v1728_v47 = vpop.eup %1727  ;;  %1270 = vst [vmem:[%s2208_s19 + $0xd0] sm:$0xff] %v1233_v13 }
 0x334   : > { %v1730_v44 = vpop.eup %1729  ;;  %v1239_v19 = vmul.f32 %v1728_v47, %v2191_v9 }
 0x335   : > { %v1237_v6 = vmul.f32 %v1730_v44, %v2193_v50 }
 0x336   : > { %1273 = vst [vmem:[%s2208_s19 + $0xe8] sm:$0xff] %v1239_v19 }
 0x337   : > { %v1732_v46 = vpop.eup %1731  ;;  %1272 = vst [vmem:[%s2208_s19 + $0xe0] sm:$0xff] %v1237_v6 }
 0x338   : > { %v1734_v22 = vpop.eup %1733  ;;  %v1243_v24 = vmul.f32 %v1732_v46, %v2197_v23 }
 0x339   : > { %v1241_v45 = vmul.f32 %v1734_v22, %v2199_v25 }
 0x33a   : > { %1275 = vst [vmem:[%s2208_s19 + $0xf8] sm:$0xff] %v1243_v24 }
 0x33b   : > { %1274 = vst [vmem:[%s2208_s19 + $0xf0] sm:$0xff] %v1241_v45 }
 0x33c PF: > { %s15_s18 = sadd.s32 1, %s1741_s18  }
 0x33d   : > { %p12_p4 = scmp.ge.s32.totalorder %s15_s18, 4  }
 0x33f   :  { %14 = sbr.rel (!%p12_p4) target bundleno = 1 (0x1), region = 70 }

</bundles_post_ra>
